<compile_context>
chip_gen: v7x
topology: tpu7x:2x2x1
jax: 0.10.0
libtpu: 0.0.40
codegen_flags: <defaults>
</compile_context>

<pallas_src>
import functools

import jax
import jax.numpy as jnp
from jax.experimental import pallas as pl
from jax.experimental.pallas import tpu as pltpu


def _round_up(x, m):
    return ((x + m - 1) // m) * m


def _cdiv(a, b):
    return (a + b - 1) // b


def _modern_vpu():
    """True on chips with a bf16 VPU + MXU slack (v6e/v7x); False on v5e & older."""
    try:
        kind = jax.devices()[0].device_kind.lower()
    except Exception:
        return True
    return not any(tag in kind for tag in ("v2", "v3", "v4", "v5"))


def _critic_kernel(state_ref, action_ref, w1s_ref, w1a_ref, b1_ref,
                   w2_ref, b2_ref, w3r_ref, w3c_ref, b3_ref, o_ref,
                   *, modern):
    # state:(TB,D) f32   action:(TB,1) f32
    # w1s:(D,H) f32  w1a:(1,H) f32  b1:(1,H) f32
    # w2:(H,H) bf16  b2:(1,H) f32
    # w3r:(1,H) f32 (row form)   w3c:(H,1) bf16 (col form)   b3:(1,1) f32
    if modern:
        # v6e/v7x: push layers 1 & 3 onto the idle MXU, bf16 epilogue on VPU.
        h1 = jnp.dot(state_ref[...].astype(jnp.bfloat16),
                     w1s_ref[...].astype(jnp.bfloat16),
                     preferred_element_type=jnp.float32)
        h1 = h1 + action_ref[...] * w1a_ref[...] + b1_ref[...]
        h1 = jnp.maximum(h1, 0.0).astype(jnp.bfloat16)                 # relu

        h2 = jnp.dot(h1, w2_ref[...], preferred_element_type=jnp.float32)
        h2 = jnp.maximum(h2.astype(jnp.bfloat16)
                         + b2_ref[...].astype(jnp.bfloat16), 0.0)      # relu (bf16)

        q = jnp.dot(h2, w3c_ref[...], preferred_element_type=jnp.float32)
        q = q + b3_ref[...]
    else:
        # v5e: MXU is binding for layer 2; keep VPU work in exact f32.
        D = w1s_ref.shape[0]
        h1 = action_ref[...] * w1a_ref[...] + b1_ref[...]
        if D <= 8:   # exact-f32 broadcast FMAs instead of a K=D f32 MXU matmul
            for k in range(D):
                h1 = h1 + state_ref[:, k:k + 1] * w1s_ref[k:k + 1, :]
        else:
            h1 = h1 + jnp.dot(state_ref[...], w1s_ref[...],
                              preferred_element_type=jnp.float32)
        h1 = jnp.maximum(h1, 0.0)                                      # relu

        h2 = jnp.dot(h1.astype(jnp.bfloat16), w2_ref[...],
                     preferred_element_type=jnp.float32)
        h2 = jnp.maximum(h2 + b2_ref[...], 0.0)                        # relu (f32)

        # Layer 3 on VPU + XLU lane reduce (MXU has no slack on v5e).
        q = jnp.sum(h2 * w3r_ref[...], axis=-1, keepdims=True) + b3_ref[...]

    o_ref[...] = jnp.tanh(q).astype(o_ref.dtype)                       # tanh


def critic_forward(state, action, kernel_params, *, modern=None):
    """state: (B, D) f32, action: (B, 1) f32 -> (B, 1) f32."""
    w1s, w1a, b1, w2, b2, w3r, w3c, b3 = kernel_params
    if modern is None:
        modern = _modern_vpu()
    B, D = state.shape
    H = w2.shape[0]

    # Batch tiling: multiples of 8 sublanes. Small batches -> single tile.
    # Large batches -> >=2 tiles (feeds both v7x TCs), capped at 1024 rows
    # (~2 MiB f32 activations) to amortize the ~0.35us per-grid-step overhead.
    if B <= 256:
        TB = _round_up(B, 8)
    else:
        TB = min(1024, _round_up(_cdiv(B, 2), 8))
    Bp = _round_up(B, TB)
    if Bp != B:
        state = jnp.pad(state, ((0, Bp - B), (0, 0)))
        action = jnp.pad(action, ((0, Bp - B), (0, 0)))

    grid = (Bp // TB,)
    row_spec = lambda w: pl.BlockSpec((TB, w), lambda i: (i, 0))
    const_spec = lambda shape: pl.BlockSpec(shape, lambda i: (0, 0))

    cost = pl.CostEstimate(
        flops=2 * Bp * ((D + 1) * H + H * H + H),
        transcendentals=Bp,                                   # tanh
        bytes_accessed=(Bp * (D + 1 + 1)) * 4                 # state+action+out
        + (w1s.size + w1a.size + b1.size + b2.size + w3r.size + b3.size) * 4
        + (w2.size + w3c.size) * 2,                           # bf16 weights
    )

    out = pl.pallas_call(
        functools.partial(_critic_kernel, modern=modern),
        out_shape=jax.ShapeDtypeStruct((Bp, 1), jnp.float32),
        grid=grid,
        in_specs=[
            row_spec(D),            # state   (pipelined over batch tiles)
            row_spec(1),            # action
            const_spec((D, H)),     # w1_state  (VMEM-resident: constant index)
            const_spec((1, H)),     # w1_action
            const_spec((1, H)),     # b1
            const_spec((H, H)),     # w2 (bf16)
            const_spec((1, H)),     # b2
            const_spec((1, H)),     # w3 row (f32)
            const_spec((H, 1)),     # w3 col (bf16)
            const_spec((1, 1)),     # b3
        ],
        out_specs=row_spec(1),
        compiler_params=pltpu.CompilerParams(
            dimension_semantics=("parallel",),   # shard batch tiles on v7x TCs
            vmem_limit_bytes=16 << 20,           # working set ~7 MiB at TB=1024
        ),
        cost_estimate=cost,
    )(state, action, w1s, w1a, b1, w2, b2, w3r, w3c, b3)
    return out[:B]


def init_critic_params(key, state_dim, hidden=512):
    """PyTorch-equivalent f32 params. Linear y = x @ W + b (W is (in, out))."""
    d_in = state_dim + 1
    k1, k2, k3 = jax.random.split(key, 3)

    def lin(k, fan_in, fan_out):
        bound = 1.0 / jnp.sqrt(jnp.float32(fan_in))
        kw, kb = jax.random.split(k)
        w = jax.random.uniform(kw, (fan_in, fan_out), jnp.float32, -bound, bound)
        b = jax.random.uniform(kb, (1, fan_out), jnp.float32, -bound, bound)
        return w, b

    w1, b1 = lin(k1, d_in, hidden)
    w2, b2 = lin(k2, hidden, hidden)
    w3, b3 = lin(k3, hidden, 1)
    return (w1, b1, w2, b2, w3, b3)


def prepare_kernel_params(params, state_dim):
    """One-time (amortized) repack of params into the kernel layout."""
    w1, b1, w2, b2, w3, b3 = params
    w1s = w1[:state_dim]                   # (D, H)  state rows of layer-1 weight
    w1a = w1[state_dim:state_dim + 1]      # (1, H)  action row of layer-1 weight
    w2_bf16 = w2.astype(jnp.bfloat16)      # dominant weight -> bf16 (halves DMA)
    w3r = w3.T                             # (1, H)  f32 row  (v5e VPU/XLU path)
    w3c = w3.astype(jnp.bfloat16)          # (H, 1)  bf16 col (v6e/v7x MXU path)
    return (w1s, w1a, b1, w2_bf16, b2, w3r, w3c, b3)


def critic_reference(state, action, params):
    w1, b1, w2, b2, w3, b3 = params
    sa = jnp.concatenate([state, action], axis=1)
    h1 = jax.nn.relu(sa @ w1 + b1)
    h2 = jax.nn.relu(h1 @ w2 + b2)
    return jnp.tanh(h2 @ w3 + b3)


if __name__ == "__main__":
    key = jax.random.PRNGKey(0)
    k_data, k_params = jax.random.split(key)

    state_dim, hidden = 4, 512
    params = init_critic_params(k_params, state_dim, hidden=hidden)
    kernel_params = prepare_kernel_params(params, state_dim)

    # B=8: small single-tile rollout case; B=384: multi-tile (grid=2) + padding.
    for B in (8, 384):
        ks, ka = jax.random.split(jax.random.fold_in(k_data, B))
        state = jax.random.normal(ks, (B, state_dim), jnp.float32)
        action = jax.random.normal(ka, (B, 1), jnp.float32)

        q = jax.block_until_ready(critic_forward(state, action, kernel_params))
        q_ref = critic_reference(state, action, params)

        assert q.shape == (B, 1)
        # bf16 weight/MXU feeds intentionally diverge from the f32 reference.
        assert jnp.allclose(q, q_ref, atol=2e-2, rtol=2e-2), (B, q[:4], q_ref[:4])

    print("KERNEL_OK")
</pallas_src>

<mosaic_0001>
module attributes {stable_mosaic.version = 11 : i64} {
  func.func @_critic_kernel(%arg0: i32, %arg1: memref<8x4xf32, #tpu.memory_space<vmem>>, %arg2: memref<8x1xf32, #tpu.memory_space<vmem>>, %arg3: memref<4x512xf32, #tpu.memory_space<vmem>>, %arg4: memref<1x512xf32, #tpu.memory_space<vmem>>, %arg5: memref<1x512xf32, #tpu.memory_space<vmem>>, %arg6: memref<512x512xbf16, #tpu.memory_space<vmem>>, %arg7: memref<1x512xf32, #tpu.memory_space<vmem>>, %arg8: memref<1x512xf32, #tpu.memory_space<vmem>>, %arg9: memref<512x1xbf16, #tpu.memory_space<vmem>>, %arg10: memref<1x1xf32, #tpu.memory_space<vmem>>, %arg11: memref<8x1xf32, #tpu.memory_space<vmem>>) attributes {dimension_semantics = [#tpu.dimension_semantics<parallel>], iteration_bounds = array<i64: 1>, scalar_prefetch = 0 : i64, scratch_operands = 0 : i64, tpu.core_type = #tpu.core_type<tc>, window_params = [{transform_indices = @transform_0, window_bounds = array<i64: 8, 4>}, {transform_indices = @transform_1, window_bounds = array<i64: 8, 1>}, {pipeline_mode = #tpu.pipeline_mode<synchronous>, transform_indices = @transform_2, window_bounds = array<i64: 4, 512>}, {pipeline_mode = #tpu.pipeline_mode<synchronous>, transform_indices = @transform_3, window_bounds = array<i64: 1, 512>}, {pipeline_mode = #tpu.pipeline_mode<synchronous>, transform_indices = @transform_4, window_bounds = array<i64: 1, 512>}, {pipeline_mode = #tpu.pipeline_mode<synchronous>, transform_indices = @transform_5, window_bounds = array<i64: 512, 512>}, {pipeline_mode = #tpu.pipeline_mode<synchronous>, transform_indices = @transform_6, window_bounds = array<i64: 1, 512>}, {pipeline_mode = #tpu.pipeline_mode<synchronous>, transform_indices = @transform_7, window_bounds = array<i64: 1, 512>}, {pipeline_mode = #tpu.pipeline_mode<synchronous>, transform_indices = @transform_8, window_bounds = array<i64: 512, 1>}, {pipeline_mode = #tpu.pipeline_mode<synchronous>, transform_indices = @transform_9, window_bounds = array<i64: 1, 1>}, {transform_indices = @transform_10, window_bounds = array<i64: 8, 1>}]} {
    %c0 = arith.constant 0 : index
    %c0_0 = arith.constant 0 : index
    %0 = vector.load %arg1[%c0, %c0_0] : memref<8x4xf32, #tpu.memory_space<vmem>>, vector<8x4xf32>
    %1 = arith.truncf %0 : vector<8x4xf32> to vector<8x4xbf16>
    %c0_1 = arith.constant 0 : index
    %c0_2 = arith.constant 0 : index
    %2 = vector.load %arg3[%c0_1, %c0_2] : memref<4x512xf32, #tpu.memory_space<vmem>>, vector<4x512xf32>
    %3 = arith.truncf %2 : vector<4x512xf32> to vector<4x512xbf16>
    %cst = arith.constant dense<0.000000e+00> : vector<8x512xf32>
    %4 = tpu.matmul %1, %3, %cst {dimension_numbers = #tpu.dot_dimension_numbers<[1], [0], [0], [1], [0, 0, 1, 1], [], []>} : vector<8x4xbf16>, vector<4x512xbf16>, vector<8x512xf32> -> vector<8x512xf32>
    %c0_3 = arith.constant 0 : index
    %c0_4 = arith.constant 0 : index
    %5 = vector.load %arg2[%c0_3, %c0_4] : memref<8x1xf32, #tpu.memory_space<vmem>>, vector<8x1xf32>
    %c0_5 = arith.constant 0 : index
    %c0_6 = arith.constant 0 : index
    %6 = vector.load %arg4[%c0_5, %c0_6] : memref<1x512xf32, #tpu.memory_space<vmem>>, vector<1x512xf32>
    %7 = vector.broadcast %5 : vector<8x1xf32> to vector<8x512xf32>
    %8 = vector.broadcast %6 : vector<1x512xf32> to vector<8x512xf32>
    %9 = arith.mulf %7, %8 : vector<8x512xf32>
    %10 = arith.addf %4, %9 : vector<8x512xf32>
    %c0_7 = arith.constant 0 : index
    %c0_8 = arith.constant 0 : index
    %11 = vector.load %arg5[%c0_7, %c0_8] : memref<1x512xf32, #tpu.memory_space<vmem>>, vector<1x512xf32>
    %12 = vector.broadcast %11 : vector<1x512xf32> to vector<8x512xf32>
    %13 = arith.addf %10, %12 : vector<8x512xf32>
    %cst_9 = arith.constant 0.000000e+00 : f32
    %14 = vector.broadcast %cst_9 : f32 to vector<8x512xf32>
    %15 = arith.maximumf %13, %14 : vector<8x512xf32>
    %16 = arith.truncf %15 : vector<8x512xf32> to vector<8x512xbf16>
    %c0_10 = arith.constant 0 : index
    %c0_11 = arith.constant 0 : index
    %17 = vector.load %arg6[%c0_10, %c0_11] : memref<512x512xbf16, #tpu.memory_space<vmem>>, vector<512x512xbf16>
    %cst_12 = arith.constant dense<0.000000e+00> : vector<8x512xf32>
    %18 = tpu.matmul %16, %17, %cst_12 {dimension_numbers = #tpu.dot_dimension_numbers<[1], [0], [0], [1], [0, 0, 1, 1], [], []>} : vector<8x512xbf16>, vector<512x512xbf16>, vector<8x512xf32> -> vector<8x512xf32>
    %19 = arith.truncf %18 : vector<8x512xf32> to vector<8x512xbf16>
    %c0_13 = arith.constant 0 : index
    %c0_14 = arith.constant 0 : index
    %20 = vector.load %arg7[%c0_13, %c0_14] : memref<1x512xf32, #tpu.memory_space<vmem>>, vector<1x512xf32>
    %21 = arith.truncf %20 : vector<1x512xf32> to vector<1x512xbf16>
    %22 = vector.broadcast %21 : vector<1x512xbf16> to vector<8x512xbf16>
    %23 = arith.addf %19, %22 : vector<8x512xbf16>
    %cst_15 = arith.constant 0.000000e+00 : bf16
    %24 = vector.broadcast %cst_15 : bf16 to vector<8x512xbf16>
    %25 = arith.maximumf %23, %24 : vector<8x512xbf16>
    %c0_16 = arith.constant 0 : index
    %c0_17 = arith.constant 0 : index
    %26 = vector.load %arg9[%c0_16, %c0_17] : memref<512x1xbf16, #tpu.memory_space<vmem>>, vector<512x1xbf16>
    %cst_18 = arith.constant dense<0.000000e+00> : vector<8x1xf32>
    %27 = tpu.matmul %25, %26, %cst_18 {dimension_numbers = #tpu.dot_dimension_numbers<[1], [0], [0], [1], [0, 0, 1, 1], [], []>} : vector<8x512xbf16>, vector<512x1xbf16>, vector<8x1xf32> -> vector<8x1xf32>
    %c0_19 = arith.constant 0 : index
    %c0_20 = arith.constant 0 : index
    %28 = vector.load %arg10[%c0_19, %c0_20] : memref<1x1xf32, #tpu.memory_space<vmem>>, vector<1x1xf32>
    %29 = vector.broadcast %28 : vector<1x1xf32> to vector<8x1xf32>
    %30 = arith.addf %27, %29 : vector<8x1xf32>
    %31 = math.tanh %30 : vector<8x1xf32>
    %c0_21 = arith.constant 0 : index
    %c0_22 = arith.constant 0 : index
    %32 = vector.load %arg11[%c0_21, %c0_22] : memref<8x1xf32, #tpu.memory_space<vmem>>, vector<8x1xf32>
    tpu.vector_store %arg11[%c0_21, %c0_22], %31 {strides = array<i32>} : memref<8x1xf32, #tpu.memory_space<vmem>>, vector<8x1xf32>,
    return
  }
  func.func @transform_0(%arg0: i32) -> (i32, i32) {
    %c0_i32 = arith.constant 0 : i32
    %c0_i32_0 = arith.constant 0 : i32
    return %arg0, %c0_i32 : i32, i32
  }
  func.func @transform_1(%arg0: i32) -> (i32, i32) {
    %c0_i32 = arith.constant 0 : i32
    %c0_i32_0 = arith.constant 0 : i32
    return %arg0, %c0_i32 : i32, i32
  }
  func.func @transform_2(%arg0: i32) -> (i32, i32) {
    %c0_i32 = arith.constant 0 : i32
    %c0_i32_0 = arith.constant 0 : i32
    %c0_i32_1 = arith.constant 0 : i32
    return %c0_i32, %c0_i32_0 : i32, i32
  }
  func.func @transform_3(%arg0: i32) -> (i32, i32) {
    %c0_i32 = arith.constant 0 : i32
    %c0_i32_0 = arith.constant 0 : i32
    %c0_i32_1 = arith.constant 0 : i32
    return %c0_i32, %c0_i32_0 : i32, i32
  }
  func.func @transform_4(%arg0: i32) -> (i32, i32) {
    %c0_i32 = arith.constant 0 : i32
    %c0_i32_0 = arith.constant 0 : i32
    %c0_i32_1 = arith.constant 0 : i32
    return %c0_i32, %c0_i32_0 : i32, i32
  }
  func.func @transform_5(%arg0: i32) -> (i32, i32) {
    %c0_i32 = arith.constant 0 : i32
    %c0_i32_0 = arith.constant 0 : i32
    %c0_i32_1 = arith.constant 0 : i32
    return %c0_i32, %c0_i32_0 : i32, i32
  }
  func.func @transform_6(%arg0: i32) -> (i32, i32) {
    %c0_i32 = arith.constant 0 : i32
    %c0_i32_0 = arith.constant 0 : i32
    %c0_i32_1 = arith.constant 0 : i32
    return %c0_i32, %c0_i32_0 : i32, i32
  }
  func.func @transform_7(%arg0: i32) -> (i32, i32) {
    %c0_i32 = arith.constant 0 : i32
    %c0_i32_0 = arith.constant 0 : i32
    %c0_i32_1 = arith.constant 0 : i32
    return %c0_i32, %c0_i32_0 : i32, i32
  }
  func.func @transform_8(%arg0: i32) -> (i32, i32) {
    %c0_i32 = arith.constant 0 : i32
    %c0_i32_0 = arith.constant 0 : i32
    %c0_i32_1 = arith.constant 0 : i32
    return %c0_i32, %c0_i32_0 : i32, i32
  }
  func.func @transform_9(%arg0: i32) -> (i32, i32) {
    %c0_i32 = arith.constant 0 : i32
    %c0_i32_0 = arith.constant 0 : i32
    %c0_i32_1 = arith.constant 0 : i32
    return %c0_i32, %c0_i32_0 : i32, i32
  }
  func.func @transform_10(%arg0: i32) -> (i32, i32) {
    %c0_i32 = arith.constant 0 : i32
    %c0_i32_0 = arith.constant 0 : i32
    return %arg0, %c0_i32 : i32, i32
  }
}

</mosaic_0001>

<bundles_post_ra>
// kernel: tpu_custom_call.1
= control target key start
LH: loop header
LB: loop body
LE: loop exit
PB: predicated region body
PF: predicated region fallthrough
CT: control target
= control target key end

     0   :  { %s2286_s0 = inlined_call_operand.vmem [shape: f32[8,4], index: 0, kind: input, shape index: {}]   ;;  %s2287_s1 = inlined_call_operand.vmem [shape: f32[8,1], index: 1, kind: input, shape index: {}]   ;;  %s2288_s2 = inlined_call_operand.vmem [shape: f32[4,512], index: 2, kind: input, shape index: {}]   ;;  %s2289_s3 = inlined_call_operand.vmem [shape: f32[1,512], index: 3, kind: input, shape index: {}]   ;;  %s2290_s4 = inlined_call_operand.vmem [shape: f32[1,512], index: 4, kind: input, shape index: {}]   ;;  %s2291_s5 = inlined_call_operand.hbm [shape: bf16[512,512], index: 5, kind: input, shape index: {}]   ;;  %s2292_s6 = inlined_call_operand.vmem [shape: f32[1,512], index: 6, kind: input, shape index: {}]   ;;  %s2293_s7 = inlined_call_operand.vmem [shape: f32[1,512], index: 7, kind: input, shape index: {}]   ;;  %s2294_s8 = inlined_call_operand.vmem [shape: bf16[512,1], index: 8, kind: input, shape index: {}]   ;;  %s2295_s9 = inlined_call_operand.<no memory space> [shape: f32[1,1], index: 9, kind: input, shape index: {}]   ;;  %s2296_s10 = inlined_call_operand.vmem [shape: f32[8,1], index: 10, kind: output, shape index: {}]  }
   0x1   :  { %v15_v0 = vstv %s2295_s9 }
   0x2   :  { %16 = vst [vmem:[#allocation2] sm:$0x1] %v15_v0 }
   0x3   :  { %17 = vsyncpa [#allocation4], 0  ;;  %s2054_s15 = smov [#allocation3]   ;;  %s2030_s18 = scalar_lea.hbm %s2291_s5, 16384 }
   0x4   :  { %s33_s16 = sshll.u32 %s2054_s15, 4  ;;  %p2031_p0 = scmp.ne.s32.totalorder %s2291_s5, %s2030_s18  ;;  %s34_s16 = int_to_ptr.vmem [resolvable:$true] %s33_s16 }
   0x5   :  { %p2034_p1 = scmp.lt.u32.totalorder %s2030_s18, %s2291_s5 }
   0x7   :  { %p2036_p2 = pnand %p2034_p1, %p2031_p0 }
   0x9   :  { %2039 = shalt.err (!%p2036_p2)
}
   0xa   :  { %s2040_s9 = scalar_lea.vmem %s34_s16, 16384  ;;  %p2045_p4 = scmp.lt.s32.totalorder %s34_s16, %s34_s16 }
   0xb   :  { %p2041_p3 = scmp.ne.s32.totalorder %s34_s16, %s2040_s9  ;;  %p2046_p5 = scmp.lt.s32.totalorder %s2040_s9, %s2040_s9 }
   0xd   :  { %p2047_p6 = por %p2046_p5, %p2045_p4 }
   0xf   :  { %p2048_p7 = pnand %p2047_p6, %p2041_p3 }
  0x11   :  { %2051 = shalt.err (!%p2048_p7)
}
  0x12   :  { %s2055_s23 = smov 256   ;;  %s2056_s24 = smov 16  }
  0x13   :  { %39 = dma.hbm_to_vmem [thread:$0]  %s2291_s5, 16384, %s34_s16, [#allocation4], %s2055_s23, %s2055_s23, %s2056_s24  }
  0x14   :  { %2052 = dma.done.wait [#allocation4], 16384  }
  0x15   :  { %2053 = vsyncadd [#allocation4], 4294950912  ;;  %v2057_v1 = vmov 0   ;;  %v54_v2 = vld [vmem:[%s2288_s2] sm:$0xff]  ;;  %vm102_vm0 = vcmask 1041408   ;;  %v55_v3 = vld [vmem:[%s2288_s2 + $0x8] sm:$0xff] }
  0x16   :  { %147 = vmatprep.mubr.bf16.mxu0 %v2057_v1  ;;  %188 = vmatprep.mubr.bf16.mxu1 %v2057_v1  ;;  %v58_v4 = vcombine.high %v54_v2, %v54_v2  ;;  %v59_v5 = vcombine.high %v55_v3, %v55_v3  ;;  %v62_v6 = vpack.c.bf16 %v54_v2, %v54_v2  ;;  %v66_v8 = vld [vmem:[%s2287_s1] sm:$0xff]  ;;  %vm98_vm1 = vcmask 31744   ;;  %v1807_v18 = vld [vmem:[#allocation3 + $0x8] ss:$16 sps:$4 sm:$0xff]  }
  0x17   :  { %1801 = vset.pattern.permute.xlu0 %v2057_v1  ;;  %v64_v7 = vpack.c.bf16 %v55_v3, %v55_v3  ;;  %v52_v9 = vld [vmem:[%s2286_s0] sm:$0xff]  ;;  %v1813_v22 = vld [vmem:[#allocation3 + $0x28] ss:$16 sps:$4 sm:$0xff]   ;;  %vm1573_vm2 = vcmask 7168  }
  0x18   :  { %70 = vperm.xlu0 %1801, %v66_v8   ;;  %v63_v10 = vpack.c.bf16 %v58_v4, %v58_v4  ;;  %v65_v11 = vpack.c.bf16 %v59_v5, %v59_v5  ;;  %v104_v12 = vsel %vm102_vm0, %v62_v6, 0  ;;  %v1806_v14 = vld [vmem:[#allocation3 + $0x4] ss:$16 sps:$4 sm:$0xff]   ;;  %v1809_v15 = vld [vmem:[#allocation3 + $0xc] ss:$16 sps:$4 sm:$0xff]   ;;  %v53_v16 = vpack.c.bf16 %v52_v9, %v52_v9 }
  0x19   :  { %v110_v13 = vsel %vm102_vm0, %v64_v7, 0  ;;  %v1804_v17 = vld [vmem:[#allocation3] ss:$16 sps:$4 sm:$0xff]   ;;  %v1812_v19 = vld [vmem:[#allocation3 + $0x24] ss:$16 sps:$4 sm:$0xff]  }
  0x1a   :  { %1580 = vmatprep.subr.msk.bf16.mxu0 %vm102_vm0, %v63_v10  ;;  %1582 = vmatprep.subr.msk.bf16.mxu1 %vm102_vm0, %v65_v11  ;;  %v1815_v20 = vld [vmem:[#allocation3 + $0x2c] ss:$16 sps:$4 sm:$0xff]   ;;  %v1810_v21 = vld [vmem:[#allocation3 + $0x20] ss:$16 sps:$4 sm:$0xff]   ;;  %v1818_v23 = vld [vmem:[#allocation3 + $0x44] ss:$16 sps:$4 sm:$0xff]  }
  0x1b   :  { %116 = vmatpush1.bf16.msra.mxu0 %v104_v12  ;;  %157 = vmatpush1.bf16.msra.mxu1 %v110_v13  ;;  %v1821_v24 = vld [vmem:[#allocation3 + $0x4c] ss:$16 sps:$4 sm:$0xff]   ;;  %v1816_v25 = vld [vmem:[#allocation3 + $0x40] ss:$16 sps:$4 sm:$0xff]   ;;  %v1819_v26 = vld [vmem:[#allocation3 + $0x48] ss:$16 sps:$4 sm:$0xff]  }
  0x1c   :  { %999 = vmatprep.subr.bf16.mxu0 %v1806_v14  ;;  %1081 = vmatprep.subr.bf16.mxu1 %v1809_v15  ;;  %v1824_v27 = vld [vmem:[#allocation3 + $0x64] ss:$16 sps:$4 sm:$0xff]   ;;  %v1827_v28 = vld [vmem:[#allocation3 + $0x6c] ss:$16 sps:$4 sm:$0xff]   ;;  %v1822_v29 = vld [vmem:[#allocation3 + $0x60] ss:$16 sps:$4 sm:$0xff]  }
  0x1d   :  { %v1825_v30 = vld [vmem:[#allocation3 + $0x68] ss:$16 sps:$4 sm:$0xff]   ;;  %v1830_v31 = vld [vmem:[#allocation3 + $0x84] ss:$16 sps:$4 sm:$0xff]   ;;  %v1833_v32 = vld [vmem:[#allocation3 + $0x8c] ss:$16 sps:$4 sm:$0xff]  }
  0x1e   :  { %1581 = vmatmul.mubr.msk.bf16.vlgmr.msra.gmra.mrb[0].mxu0 %vm98_vm1, %v53_v16  ;;  %1583 = vmatmul.mubr.msk.bf16.vlgmr.msra.gmra.mrb[0].mxu1 %vm98_vm1, %v53_v16  ;;  %v1828_v33 = vld [vmem:[#allocation3 + $0x80] ss:$16 sps:$4 sm:$0xff]   ;;  %v1831_v34 = vld [vmem:[#allocation3 + $0x88] ss:$16 sps:$4 sm:$0xff]   ;;  %v1836_v35 = vld [vmem:[#allocation3 + $0xa4] ss:$16 sps:$4 sm:$0xff]  }
  0x1f   :  { %1000 = vmatpush1.bf16.msra.mxu0 %v1804_v17  ;;  %1082 = vmatpush1.bf16.msra.mxu1 %v1807_v18  ;;  %v1839_v36 = vld [vmem:[#allocation3 + $0xac] ss:$16 sps:$4 sm:$0xff]   ;;  %v1834_v37 = vld [vmem:[#allocation3 + $0xa0] ss:$16 sps:$4 sm:$0xff]   ;;  %v1837_v38 = vld [vmem:[#allocation3 + $0xa8] ss:$16 sps:$4 sm:$0xff]   ;;  %v74_v18 = vlaneseq }
  0x20   :  { %1001 = vmatprep.subr.bf16.mxu0 %v1812_v19  ;;  %1083 = vmatprep.subr.bf16.mxu1 %v1815_v20  ;;  %v1842_v39 = vld [vmem:[#allocation3 + $0xc4] ss:$16 sps:$4 sm:$0xff]   ;;  %v1845_v40 = vld [vmem:[#allocation3 + $0xcc] ss:$16 sps:$4 sm:$0xff]   ;;  %v1840_v41 = vld [vmem:[#allocation3 + $0xc0] ss:$16 sps:$4 sm:$0xff]  }
  0x21   :  { %v1843_v42 = vld [vmem:[#allocation3 + $0xc8] ss:$16 sps:$4 sm:$0xff]   ;;  %v1848_v43 = vld [vmem:[#allocation3 + $0xe4] ss:$16 sps:$4 sm:$0xff]   ;;  %v1851_v44 = vld [vmem:[#allocation3 + $0xec] ss:$16 sps:$4 sm:$0xff]  }
  0x22   :  { %v1846_v45 = vld [vmem:[#allocation3 + $0xe0] ss:$16 sps:$4 sm:$0xff]   ;;  %v1849_v46 = vld [vmem:[#allocation3 + $0xe8] ss:$16 sps:$4 sm:$0xff]   ;;  %v1854_v47 = vld [vmem:[#allocation3 + $0x104] ss:$16 sps:$4 sm:$0xff]  }
  0x23   :  { %1002 = vmatpush1.bf16.msra.mxu0 %v1810_v21  ;;  %1084 = vmatpush1.bf16.msra.mxu1 %v1813_v22  ;;  %v1857_v48 = vld [vmem:[#allocation3 + $0x10c] ss:$16 sps:$4 sm:$0xff]   ;;  %v1852_v49 = vld [vmem:[#allocation3 + $0x100] ss:$16 sps:$4 sm:$0xff]   ;;  %v1855_v50 = vld [vmem:[#allocation3 + $0x108] ss:$16 sps:$4 sm:$0xff]  }
  0x24   :  { %1003 = vmatprep.subr.bf16.mxu0 %v1818_v23  ;;  %1085 = vmatprep.subr.bf16.mxu1 %v1821_v24  ;;  %v1860_v51 = vld [vmem:[#allocation3 + $0x124] ss:$16 sps:$4 sm:$0xff]   ;;  %v1863_v52 = vld [vmem:[#allocation3 + $0x12c] ss:$16 sps:$4 sm:$0xff]   ;;  %v1858_v53 = vld [vmem:[#allocation3 + $0x120] ss:$16 sps:$4 sm:$0xff]  }
  0x25   :  { %v1861_v54 = vld [vmem:[#allocation3 + $0x128] ss:$16 sps:$4 sm:$0xff]   ;;  %v1866_v55 = vld [vmem:[#allocation3 + $0x144] ss:$16 sps:$4 sm:$0xff]   ;;  %v1869_v56 = vld [vmem:[#allocation3 + $0x14c] ss:$16 sps:$4 sm:$0xff]  }
  0x26   :  { %v1864_v57 = vld [vmem:[#allocation3 + $0x140] ss:$16 sps:$4 sm:$0xff]   ;;  %v1867_v58 = vld [vmem:[#allocation3 + $0x148] ss:$16 sps:$4 sm:$0xff]   ;;  %v1872_v59 = vld [vmem:[#allocation3 + $0x164] ss:$16 sps:$4 sm:$0xff]  }
  0x27   :  { %1004 = vmatpush1.bf16.msra.mxu0 %v1816_v25  ;;  %1086 = vmatpush1.bf16.msra.mxu1 %v1819_v26  ;;  %v1875_v60 = vld [vmem:[#allocation3 + $0x16c] ss:$16 sps:$4 sm:$0xff]   ;;  %v1870_v61 = vld [vmem:[#allocation3 + $0x160] ss:$16 sps:$4 sm:$0xff]   ;;  %v1873_v62 = vld [vmem:[#allocation3 + $0x168] ss:$16 sps:$4 sm:$0xff]  }
  0x28   :  { %1005 = vmatprep.subr.bf16.mxu0 %v1824_v27  ;;  %1087 = vmatprep.subr.bf16.mxu1 %v1827_v28  ;;  %v1878_v63 = vld [vmem:[#allocation3 + $0x184] ss:$16 sps:$4 sm:$0xff]   ;;  %v1881_v0 = vld [vmem:[#allocation3 + $0x18c] ss:$16 sps:$4 sm:$0xff]   ;;  %v1876_v2 = vld [vmem:[#allocation3 + $0x180] ss:$16 sps:$4 sm:$0xff]  }
  0x29   :  { %v1879_v3 = vld [vmem:[#allocation3 + $0x188] ss:$16 sps:$4 sm:$0xff]   ;;  %v1884_v4 = vld [vmem:[#allocation3 + $0x1a4] ss:$16 sps:$4 sm:$0xff]   ;;  %v1887_v5 = vld [vmem:[#allocation3 + $0x1ac] ss:$16 sps:$4 sm:$0xff]  }
  0x2a   :  { %v1882_v6 = vld [vmem:[#allocation3 + $0x1a0] ss:$16 sps:$4 sm:$0xff]   ;;  %v1885_v7 = vld [vmem:[#allocation3 + $0x1a8] ss:$16 sps:$4 sm:$0xff]   ;;  %v1890_v8 = vld [vmem:[#allocation3 + $0x1c4] ss:$16 sps:$4 sm:$0xff]  }
  0x2b   :  { %1006 = vmatpush1.bf16.msra.mxu0 %v1822_v29  ;;  %1088 = vmatpush1.bf16.msra.mxu1 %v1825_v30  ;;  %v1893_v9 = vld [vmem:[#allocation3 + $0x1cc] ss:$16 sps:$4 sm:$0xff]   ;;  %v1888_v10 = vld [vmem:[#allocation3 + $0x1c0] ss:$16 sps:$4 sm:$0xff]   ;;  %v1891_v11 = vld [vmem:[#allocation3 + $0x1c8] ss:$16 sps:$4 sm:$0xff]  }
  0x2c   :  { %1007 = vmatprep.subr.bf16.mxu0 %v1830_v31  ;;  %1089 = vmatprep.subr.bf16.mxu1 %v1833_v32  ;;  %v1896_v12 = vld [vmem:[#allocation3 + $0x1e4] ss:$16 sps:$4 sm:$0xff]   ;;  %v1899_v13 = vld [vmem:[#allocation3 + $0x1ec] ss:$16 sps:$4 sm:$0xff]   ;;  %v1894_v14 = vld [vmem:[#allocation3 + $0x1e0] ss:$16 sps:$4 sm:$0xff]  }
  0x2d   :  { %v1897_v15 = vld [vmem:[#allocation3 + $0x1e8] ss:$16 sps:$4 sm:$0xff]   ;;  %v1902_v16 = vld [vmem:[#allocation3 + $0x204] ss:$16 sps:$4 sm:$0xff]   ;;  %v1905_v17 = vld [vmem:[#allocation3 + $0x20c] ss:$16 sps:$4 sm:$0xff]  }
  0x2e   :  { %v75_v19 = vshrl.u32 %v74_v18, 7  ;;  %v67_v21 = vld [vmem:[%s2289_s3] sm:$0xf] }
  0x2f   :  { %1008 = vmatpush1.bf16.msra.mxu0 %v1828_v33  ;;  %1090 = vmatpush1.bf16.msra.mxu1 %v1831_v34  ;;  %v197_v31 = vld [vmem:[%s2290_s4] sm:$0xf] }
  0x30   :  { %1009 = vmatprep.subr.bf16.mxu0 %v1836_v35  ;;  %1091 = vmatprep.subr.bf16.mxu1 %v1839_v36  ;;  %v2147_v20 = vsub.s32 2, %v75_v19  ;;  %v2153_v25 = vsub.s32 0, %v75_v19  ;;  %v2155_v26 = vsub.s32 1, %v75_v19  ;;  %v2157_v27 = vsub.s32 3, %v75_v19  ;;  %v1930_v18 = vld [vmem:[#allocation3 + $0x2a0] ss:$16 sps:$4 sm:$0xff]  }
  0x31   :  { %v1933_v19 = vld [vmem:[#allocation3 + $0x2a8] ss:$16 sps:$4 sm:$0xff]  }
  0x32   :  { %v85_v22 = vrot.slane %v67_v21, %v2147_v20  ;;  %v77_v28 = vrot.slane %v67_v21, %v2153_v25  ;;  %v81_v29 = vrot.slane %v67_v21, %v2155_v26  ;;  %v89_v30 = vrot.slane %v67_v21, %v2157_v27  ;;  %v1938_v21 = vld [vmem:[#allocation3 + $0x2c4] ss:$16 sps:$4 sm:$0xff]  }
  0x33   :  { %1010 = vmatpush1.bf16.msra.mxu0 %v1834_v37  ;;  %1092 = vmatpush1.bf16.msra.mxu1 %v1837_v38  ;;  %v202_v35 = vrot.slane %v197_v31, %v2153_v25  ;;  %v210_v36 = vrot.slane %v197_v31, %v2147_v20 }
  0x34   :  { %1011 = vmatprep.subr.bf16.mxu0 %v1842_v39  ;;  %1093 = vmatprep.subr.bf16.mxu1 %v1845_v40  ;;  %v206_v39 = vrot.slane %v197_v31, %v2155_v26  ;;  %v214_v40 = vrot.slane %v197_v31, %v2157_v27  ;;  %v1945_v31 = vld [vmem:[#allocation3 + $0x2e8] ss:$16 sps:$4 sm:$0xff]  }
  0x37   :  { %1012 = vmatpush1.bf16.msra.mxu0 %v1840_v41  ;;  %1094 = vmatpush1.bf16.msra.mxu1 %v1843_v42 }
  0x38   :  { %1013 = vmatprep.subr.bf16.mxu0 %v1848_v43  ;;  %1095 = vmatprep.subr.bf16.mxu1 %v1851_v44 }
  0x3b   :  { %1014 = vmatpush1.bf16.msra.mxu0 %v1846_v45  ;;  %1096 = vmatpush1.bf16.msra.mxu1 %v1849_v46 }
  0x3c   :  { %1015 = vmatprep.subr.bf16.mxu0 %v1854_v47  ;;  %1097 = vmatprep.subr.bf16.mxu1 %v1857_v48 }
  0x3f   :  { %1016 = vmatpush1.bf16.msra.mxu0 %v1852_v49  ;;  %1098 = vmatpush1.bf16.msra.mxu1 %v1855_v50 }
  0x40   :  { %1017 = vmatprep.subr.bf16.mxu0 %v1860_v51  ;;  %1099 = vmatprep.subr.bf16.mxu1 %v1863_v52 }
  0x43   :  { %1018 = vmatpush1.bf16.msra.mxu0 %v1858_v53  ;;  %1100 = vmatpush1.bf16.msra.mxu1 %v1861_v54 }
  0x44   :  { %1019 = vmatprep.subr.bf16.mxu0 %v1866_v55  ;;  %1101 = vmatprep.subr.bf16.mxu1 %v1869_v56 }
  0x47   :  { %1020 = vmatpush1.bf16.msra.mxu0 %v1864_v57  ;;  %1102 = vmatpush1.bf16.msra.mxu1 %v1867_v58 }
  0x48   :  { %1021 = vmatprep.subr.bf16.mxu0 %v1872_v59  ;;  %1103 = vmatprep.subr.bf16.mxu1 %v1875_v60  ;;  %v1900_v59 = vld [vmem:[#allocation3 + $0x200] ss:$16 sps:$4 sm:$0xff]   ;;  %v1903_v60 = vld [vmem:[#allocation3 + $0x208] ss:$16 sps:$4 sm:$0xff]  }
  0x4b   :  { %1022 = vmatpush1.bf16.msra.mxu0 %v1870_v61  ;;  %1104 = vmatpush1.bf16.msra.mxu1 %v1873_v62  ;;  %v1908_v62 = vld [vmem:[#allocation3 + $0x224] ss:$16 sps:$4 sm:$0xff]  }
  0x4c   :  { %1023 = vmatprep.subr.bf16.mxu0 %v1878_v63  ;;  %1105 = vmatprep.subr.bf16.mxu1 %v1881_v0  ;;  %v1911_v63 = vld [vmem:[#allocation3 + $0x22c] ss:$16 sps:$4 sm:$0xff]  }
  0x4f   :  { %1024 = vmatpush1.bf16.msra.mxu0 %v1876_v2  ;;  %1106 = vmatpush1.bf16.msra.mxu1 %v1879_v3  ;;  %v1906_v2 = vld [vmem:[#allocation3 + $0x220] ss:$16 sps:$4 sm:$0xff]   ;;  %v1909_v3 = vld [vmem:[#allocation3 + $0x228] ss:$16 sps:$4 sm:$0xff]  }
  0x50   :  { %1025 = vmatprep.subr.bf16.mxu0 %v1884_v4  ;;  %1107 = vmatprep.subr.bf16.mxu1 %v1887_v5  ;;  %v1914_v4 = vld [vmem:[#allocation3 + $0x244] ss:$16 sps:$4 sm:$0xff]   ;;  %v1917_v5 = vld [vmem:[#allocation3 + $0x24c] ss:$16 sps:$4 sm:$0xff]  }
  0x53   :  { %1026 = vmatpush1.bf16.msra.mxu0 %v1882_v6  ;;  %1108 = vmatpush1.bf16.msra.mxu1 %v1885_v7  ;;  %v1912_v6 = vld [vmem:[#allocation3 + $0x240] ss:$16 sps:$4 sm:$0xff]   ;;  %v1915_v7 = vld [vmem:[#allocation3 + $0x248] ss:$16 sps:$4 sm:$0xff]  }
  0x54   :  { %1027 = vmatprep.subr.bf16.mxu0 %v1890_v8  ;;  %1109 = vmatprep.subr.bf16.mxu1 %v1893_v9  ;;  %v1920_v8 = vld [vmem:[#allocation3 + $0x264] ss:$16 sps:$4 sm:$0xff]   ;;  %v1923_v9 = vld [vmem:[#allocation3 + $0x26c] ss:$16 sps:$4 sm:$0xff]  }
  0x57   :  { %1028 = vmatpush1.bf16.msra.mxu0 %v1888_v10  ;;  %1110 = vmatpush1.bf16.msra.mxu1 %v1891_v11  ;;  %v1918_v10 = vld [vmem:[#allocation3 + $0x260] ss:$16 sps:$4 sm:$0xff]   ;;  %v1921_v11 = vld [vmem:[#allocation3 + $0x268] ss:$16 sps:$4 sm:$0xff]  }
  0x58   :  { %1029 = vmatprep.subr.bf16.mxu0 %v1896_v12  ;;  %1111 = vmatprep.subr.bf16.mxu1 %v1899_v13  ;;  %v1926_v12 = vld [vmem:[#allocation3 + $0x284] ss:$16 sps:$4 sm:$0xff]   ;;  %v1929_v13 = vld [vmem:[#allocation3 + $0x28c] ss:$16 sps:$4 sm:$0xff]  }
  0x5b   :  { %1030 = vmatpush1.bf16.msra.mxu0 %v1894_v14  ;;  %1112 = vmatpush1.bf16.msra.mxu1 %v1897_v15  ;;  %v1924_v14 = vld [vmem:[#allocation3 + $0x280] ss:$16 sps:$4 sm:$0xff]   ;;  %v1927_v15 = vld [vmem:[#allocation3 + $0x288] ss:$16 sps:$4 sm:$0xff]  }
  0x5c   :  { %1040 = vmatprep.subr.bf16.mxu0 %v1902_v16  ;;  %1122 = vmatprep.subr.bf16.mxu1 %v1905_v17  ;;  %v1932_v16 = vld [vmem:[#allocation3 + $0x2a4] ss:$16 sps:$4 sm:$0xff]   ;;  %v1935_v17 = vld [vmem:[#allocation3 + $0x2ac] ss:$16 sps:$4 sm:$0xff]  }
  0x97   :  { %v71_v23 = vpop.permute.xlu0 %70 }
  0x98   :  { %v96_v24 = vmul.f32 %v85_v22, %v71_v23  ;;  %v94_v32 = vmul.f32 %v77_v28, %v71_v23  ;;  %v95_v33 = vmul.f32 %v81_v29, %v71_v23  ;;  %v97_v34 = vmul.f32 %v89_v30, %v71_v23  ;;  %v1941_v22 = vld [vmem:[#allocation3 + $0x2cc] ss:$16 sps:$4 sm:$0xff]   ;;  %v1936_v23 = vld [vmem:[#allocation3 + $0x2c0] ss:$16 sps:$4 sm:$0xff]   ;;  %v1944_v28 = vld [vmem:[#allocation3 + $0x2e4] ss:$16 sps:$4 sm:$0xff]  }
  0x99   :  { %v1947_v29 = vld [vmem:[#allocation3 + $0x2ec] ss:$16 sps:$4 sm:$0xff]   ;;  %v1942_v30 = vld [vmem:[#allocation3 + $0x2e0] ss:$16 sps:$4 sm:$0xff]  }
  0xf1   :  { %v149_v37 = vpop.f32.mrb[0].mxu0  ;;  %v190_v38 = vpop.f32.mrb[0].mxu1 }
  0xf2   :  { %v150_v41 = vadd.f32 %v149_v37, %v94_v32  ;;  %v191_v42 = vadd.f32 %v190_v38, %v96_v24  ;;  %v151_v43 = vpop.f32.mrb[1].mxu0  ;;  %v192_v44 = vpop.f32.mrb[1].mxu1  ;;  %v1939_v24 = vld [vmem:[#allocation3 + $0x2c8] ss:$16 sps:$4 sm:$0xff]   ;;  %v1950_v32 = vld [vmem:[#allocation3 + $0x304] ss:$16 sps:$4 sm:$0xff]  }
  0xf3   :  { %v152_v45 = vadd.f32 %v151_v43, %v95_v33  ;;  %v193_v46 = vadd.f32 %v192_v44, %v97_v34  ;;  %v153_v47 = vpop.f32.mrb[2].mxu0  ;;  %v194_v48 = vpop.f32.mrb[2].mxu1  ;;  %v1953_v33 = vld [vmem:[#allocation3 + $0x30c] ss:$16 sps:$4 sm:$0xff]   ;;  %v1948_v34 = vld [vmem:[#allocation3 + $0x300] ss:$16 sps:$4 sm:$0xff]  }
  0xf4   :  { %v219_v49 = vadd.f32 %v202_v35, %v150_v41  ;;  %v2169_v50 = vadd.f32 %v210_v36, %v191_v42  ;;  %v154_v51 = vpop.f32.mrb[3].mxu0  ;;  %v195_v52 = vpop.f32.mrb[3].mxu1  ;;  %v1951_v35 = vld [vmem:[#allocation3 + $0x308] ss:$16 sps:$4 sm:$0xff]   ;;  %v1956_v36 = vld [vmem:[#allocation3 + $0x324] ss:$16 sps:$4 sm:$0xff]  }
  0xf5   :  { %v220_v53 = vadd.f32 %v206_v39, %v152_v45  ;;  %v222_v54 = vadd.f32 %v214_v40, %v193_v46  ;;  %v1959_v37 = vld [vmem:[#allocation3 + $0x32c] ss:$16 sps:$4 sm:$0xff]   ;;  %v1954_v38 = vld [vmem:[#allocation3 + $0x320] ss:$16 sps:$4 sm:$0xff]   ;;  %v1957_v39 = vld [vmem:[#allocation3 + $0x328] ss:$16 sps:$4 sm:$0xff]  }
  0xf6   :  { %v223_v55 = vmax.f32 %v219_v49, 0.0  ;;  %v1962_v40 = vld [vmem:[#allocation3 + $0x344] ss:$16 sps:$4 sm:$0xff]   ;;  %v1965_v41 = vld [vmem:[#allocation3 + $0x34c] ss:$16 sps:$4 sm:$0xff]  }
  0xf7   :  { %v224_v56 = vmax.f32 %v220_v53, 0.0  ;;  %v226_v57 = vmax.f32 %v222_v54, 0.0  ;;  %v1960_v42 = vld [vmem:[#allocation3 + $0x340] ss:$16 sps:$4 sm:$0xff]   ;;  %v1963_v43 = vld [vmem:[#allocation3 + $0x348] ss:$16 sps:$4 sm:$0xff]  }
  0xf8   :  { %v227_v61 = vpack.c.bf16 %v223_v55, %v223_v55  ;;  %v1968_v44 = vld [vmem:[#allocation3 + $0x364] ss:$16 sps:$4 sm:$0xff]   ;;  %v1971_v45 = vld [vmem:[#allocation3 + $0x36c] ss:$16 sps:$4 sm:$0xff]   ;;  %v1966_v46 = vld [vmem:[#allocation3 + $0x360] ss:$16 sps:$4 sm:$0xff]  }
  0xf9   :  { %v228_v58 = vpack.c.bf16 %v224_v56, %v224_v56  ;;  %v230_v0 = vpack.c.bf16 %v226_v57, %v226_v57  ;;  %v1969_v47 = vld [vmem:[#allocation3 + $0x368] ss:$16 sps:$4 sm:$0xff]   ;;  %v1974_v48 = vld [vmem:[#allocation3 + $0x384] ss:$16 sps:$4 sm:$0xff]   ;;  %v1977_v49 = vld [vmem:[#allocation3 + $0x38c] ss:$16 sps:$4 sm:$0xff]  }
  0xfa   :  { %v1972_v51 = vld [vmem:[#allocation3 + $0x380] ss:$16 sps:$4 sm:$0xff]   ;;  %v1975_v52 = vld [vmem:[#allocation3 + $0x388] ss:$16 sps:$4 sm:$0xff]   ;;  %v1980_v53 = vld [vmem:[#allocation3 + $0x3a4] ss:$16 sps:$4 sm:$0xff]  }
  0xfb   :  { %1031 = vmatprep.mubr.bf16.mxu0 %v228_v58  ;;  %1113 = vmatprep.mubr.bf16.mxu1 %v228_v58  ;;  %v1983_v54 = vld [vmem:[#allocation3 + $0x3ac] ss:$16 sps:$4 sm:$0xff]   ;;  %v1978_v55 = vld [vmem:[#allocation3 + $0x3a0] ss:$16 sps:$4 sm:$0xff]   ;;  %v1981_v56 = vld [vmem:[#allocation3 + $0x3a8] ss:$16 sps:$4 sm:$0xff]  }
  0xfc   :  { %1032 = vmatmul.mubr.bf16.vlgmr.msra.gmra.mrb[4].mxu0 %v227_v61  ;;  %1114 = vmatmul.mubr.bf16.vlgmr.msra.gmra.mrb[4].mxu1 %v227_v61  ;;  %v1986_v57 = vld [vmem:[#allocation3 + $0x3c4] ss:$16 sps:$4 sm:$0xff]   ;;  %v1989_v58 = vld [vmem:[#allocation3 + $0x3cc] ss:$16 sps:$4 sm:$0xff]  }
  0xfd   :  { %1041 = vmatpush1.bf16.msra.mxu0 %v1900_v59  ;;  %1123 = vmatpush1.bf16.msra.mxu1 %v1903_v60  ;;  %v1984_v59 = vld [vmem:[#allocation3 + $0x3c0] ss:$16 sps:$4 sm:$0xff]   ;;  %v1987_v60 = vld [vmem:[#allocation3 + $0x3c8] ss:$16 sps:$4 sm:$0xff]   ;;  %v1992_v61 = vld [vmem:[#allocation3 + $0x3e4] ss:$16 sps:$4 sm:$0xff]  }
  0xfe   :  { %1072 = vmatprep.mubr.bf16.mxu0 %v230_v0  ;;  %1154 = vmatprep.mubr.bf16.mxu1 %v230_v0  ;;  %v1993_v0 = vld [vmem:[#allocation3 + $0x3e8] ss:$16 sps:$4 sm:$0xff]  }
  0xff   :  { %1042 = vmatprep.subr.bf16.mxu0 %v1908_v62  ;;  %1124 = vmatprep.subr.bf16.mxu1 %v1911_v63  ;;  %v1995_v62 = vld [vmem:[#allocation3 + $0x3ec] ss:$16 sps:$4 sm:$0xff]   ;;  %v1990_v63 = vld [vmem:[#allocation3 + $0x3e0] ss:$16 sps:$4 sm:$0xff]  }
 0x101   :  { %1043 = vmatpush1.bf16.msra.mxu0 %v1906_v2  ;;  %1125 = vmatpush1.bf16.msra.mxu1 %v1909_v3  ;;  %v225_v2 = vmax.f32 %v2169_v50, 0.0  ;;  %v1996_v3 = vld [vmem:[%s2294_s8 + $0x40] sm:$0xff]  }
 0x102   :  { %1044 = vmatprep.subr.bf16.mxu0 %v1914_v4  ;;  %1126 = vmatprep.subr.bf16.mxu1 %v1917_v5  ;;  %v1997_v4 = vld [vmem:[%s2294_s8 + $0xc0] sm:$0xff]  }
 0x103   :  { %v1998_v5 = vld [vmem:[%s2294_s8] sm:$0xff]  }
 0x104   :  { %v1999_v50 = vld [vmem:[%s2294_s8 + $0x80] sm:$0xff]  }
 0x105   :  { %1045 = vmatpush1.bf16.msra.mxu0 %v1912_v6  ;;  %1127 = vmatpush1.bf16.msra.mxu1 %v1915_v7  ;;  %v229_v6 = vpack.c.bf16 %v225_v2, %v225_v2  ;;  %v2000_v7 = vld [vmem:[%s2294_s8 + $0x48] sm:$0xff]  }
 0x106   :  { %1046 = vmatprep.subr.bf16.mxu0 %v1920_v8  ;;  %1128 = vmatprep.subr.bf16.mxu1 %v1923_v9  ;;  %v2001_v8 = vld [vmem:[%s2294_s8 + $0xc8] sm:$0xff]  }
 0x107   :  { %v2002_v9 = vld [vmem:[%s2294_s8 + $0x8] sm:$0xff]  }
 0x109   :  { %1047 = vmatpush1.bf16.msra.mxu0 %v1918_v10  ;;  %1129 = vmatpush1.bf16.msra.mxu1 %v1921_v11  ;;  %v2003_v10 = vld [vmem:[%s2294_s8 + $0x88] sm:$0xff]   ;;  %v2004_v11 = vld [vmem:[%s2294_s8 + $0x50] sm:$0xff]  }
 0x10a   :  { %1048 = vmatprep.subr.bf16.mxu0 %v1926_v12  ;;  %1130 = vmatprep.subr.bf16.mxu1 %v1929_v13  ;;  %v2005_v12 = vld [vmem:[%s2294_s8 + $0xd0] sm:$0xff]  }
 0x10b   :  { %v2006_v13 = vld [vmem:[%s2294_s8 + $0x10] sm:$0xff]  }
 0x10d   :  { %1049 = vmatpush1.bf16.msra.mxu0 %v1924_v14  ;;  %1131 = vmatpush1.bf16.msra.mxu1 %v1927_v15  ;;  %v2007_v14 = vld [vmem:[%s2294_s8 + $0x90] sm:$0xff]   ;;  %v2008_v15 = vld [vmem:[%s2294_s8 + $0x58] sm:$0xff]  }
 0x10e   :  { %1050 = vmatprep.subr.bf16.mxu0 %v1932_v16  ;;  %1132 = vmatprep.subr.bf16.mxu1 %v1935_v17  ;;  %v2009_v16 = vld [vmem:[%s2294_s8 + $0xd8] sm:$0xff]  }
 0x10f   :  { %v2010_v17 = vld [vmem:[%s2294_s8 + $0x18] sm:$0xff]  }
 0x111   :  { %1051 = vmatpush1.bf16.msra.mxu0 %v1930_v18  ;;  %1133 = vmatpush1.bf16.msra.mxu1 %v1933_v19  ;;  %v2011_v18 = vld [vmem:[%s2294_s8 + $0x98] sm:$0xff]   ;;  %v2012_v19 = vld [vmem:[%s2294_s8 + $0x60] sm:$0xff]  }
 0x112   :  { %1052 = vmatprep.subr.bf16.mxu0 %v1938_v21  ;;  %1134 = vmatprep.subr.bf16.mxu1 %v1941_v22  ;;  %v2013_v21 = vld [vmem:[%s2294_s8 + $0xe0] sm:$0xff]  }
 0x113   :  { %v2014_v22 = vld [vmem:[%s2294_s8 + $0x20] sm:$0xff]  }
 0x115   :  { %1053 = vmatpush1.bf16.msra.mxu0 %v1936_v23  ;;  %1135 = vmatpush1.bf16.msra.mxu1 %v1939_v24  ;;  %v2015_v23 = vld [vmem:[%s2294_s8 + $0xa0] sm:$0xff]   ;;  %v2016_v24 = vld [vmem:[%s2294_s8 + $0x68] sm:$0xff]  }
 0x116   :  { %1054 = vmatprep.subr.bf16.mxu0 %v1944_v28  ;;  %1136 = vmatprep.subr.bf16.mxu1 %v1947_v29  ;;  %v2017_v28 = vld [vmem:[%s2294_s8 + $0xe8] sm:$0xff]  }
 0x117   :  { %v2018_v29 = vld [vmem:[%s2294_s8 + $0x28] sm:$0xff]  }
 0x119   :  { %1055 = vmatpush1.bf16.msra.mxu0 %v1942_v30  ;;  %1137 = vmatpush1.bf16.msra.mxu1 %v1945_v31  ;;  %v2019_v30 = vld [vmem:[%s2294_s8 + $0xa8] sm:$0xff]   ;;  %v2020_v31 = vld [vmem:[%s2294_s8 + $0x70] sm:$0xff]  }
 0x11a   :  { %1056 = vmatprep.subr.bf16.mxu0 %v1950_v32  ;;  %1138 = vmatprep.subr.bf16.mxu1 %v1953_v33  ;;  %v2021_v32 = vld [vmem:[%s2294_s8 + $0xf0] sm:$0xff]  }
 0x11b   :  { %v2022_v33 = vld [vmem:[%s2294_s8 + $0x30] sm:$0xff]  }
 0x11d   :  { %1057 = vmatpush1.bf16.msra.mxu0 %v1948_v34  ;;  %1139 = vmatpush1.bf16.msra.mxu1 %v1951_v35  ;;  %v2023_v34 = vld [vmem:[%s2294_s8 + $0xb0] sm:$0xff]   ;;  %v2024_v35 = vld [vmem:[%s2294_s8 + $0x78] sm:$0xff]  }
 0x11e   :  { %1058 = vmatprep.subr.bf16.mxu0 %v1956_v36  ;;  %1140 = vmatprep.subr.bf16.mxu1 %v1959_v37  ;;  %v2025_v36 = vld [vmem:[%s2294_s8 + $0xf8] sm:$0xff]  }
 0x11f   :  { %v2026_v37 = vld [vmem:[%s2294_s8 + $0x38] sm:$0xff]  }
 0x121   :  { %1059 = vmatpush1.bf16.msra.mxu0 %v1954_v38  ;;  %1141 = vmatpush1.bf16.msra.mxu1 %v1957_v39  ;;  %v2027_v38 = vld [vmem:[%s2294_s8 + $0xb8] sm:$0xff]   ;;  %v1167_v39 = vld [vmem:[%s2292_s6] sm:$0xf] }
 0x122   :  { %1060 = vmatprep.subr.bf16.mxu0 %v1962_v40  ;;  %1142 = vmatprep.subr.bf16.mxu1 %v1965_v41  ;;  %v1172_v40 = vrot.slane %v1167_v39, %v2153_v25  ;;  %v1180_v41 = vrot.slane %v1167_v39, %v2147_v20 }
 0x125   :  { %1061 = vmatpush1.bf16.msra.mxu0 %v1960_v42  ;;  %1143 = vmatpush1.bf16.msra.mxu1 %v1963_v43  ;;  %v1176_v42 = vrot.slane %v1167_v39, %v2155_v26  ;;  %v1184_v43 = vrot.slane %v1167_v39, %v2157_v27 }
 0x126   :  { %1062 = vmatprep.subr.bf16.mxu0 %v1968_v44  ;;  %1144 = vmatprep.subr.bf16.mxu1 %v1971_v45  ;;  %v1189_v44 = vpack.c.bf16 %v1172_v40, %v1172_v40  ;;  %v1191_v45 = vpack.c.bf16 %v1180_v41, %v1180_v41 }
 0x129   :  { %1063 = vmatpush1.bf16.msra.mxu0 %v1966_v46  ;;  %1145 = vmatpush1.bf16.msra.mxu1 %v1969_v47  ;;  %v1190_v46 = vpack.c.bf16 %v1176_v42, %v1176_v42  ;;  %v1192_v47 = vpack.c.bf16 %v1184_v43, %v1184_v43 }
 0x12a   :  { %1064 = vmatprep.subr.bf16.mxu0 %v1974_v48  ;;  %1146 = vmatprep.subr.bf16.mxu1 %v1977_v49  ;;  %v1194_v48 = vpack.i.b16 %v1189_v44, %v1189_v44  ;;  %v1208_v49 = vpack.i.b16 %v1191_v45, %v1191_v45 }
 0x12d   :  { %1065 = vmatpush1.bf16.msra.mxu0 %v1972_v51  ;;  %1147 = vmatpush1.bf16.msra.mxu1 %v1975_v52  ;;  %v1201_v51 = vpack.i.b16 %v1190_v46, %v1190_v46  ;;  %v1215_v52 = vpack.i.b16 %v1192_v47, %v1192_v47 }
 0x12e   :  { %1066 = vmatprep.subr.bf16.mxu0 %v1980_v53  ;;  %1148 = vmatprep.subr.bf16.mxu1 %v1983_v54  ;;  %v1199_v53 = vrot.slane %v1194_v48, %v2153_v25  ;;  %v1213_v54 = vrot.slane %v1208_v49, %v2153_v25 }
 0x12f   :  { %v1206_v20 = vrot.slane %v1201_v51, %v2153_v25  ;;  %v1220_v26 = vrot.slane %v1215_v52, %v2153_v25 }
 0x131   :  { %1067 = vmatpush1.bf16.msra.mxu0 %v1978_v55  ;;  %1149 = vmatpush1.bf16.msra.mxu1 %v1981_v56 }
 0x132   :  { %1068 = vmatprep.subr.bf16.mxu0 %v1986_v57  ;;  %1150 = vmatprep.subr.bf16.mxu1 %v1989_v58 }
 0x135   :  { %1069 = vmatpush1.bf16.msra.mxu0 %v1984_v59  ;;  %1151 = vmatpush1.bf16.msra.mxu1 %v1987_v60 }
 0x136   :  { %1070 = vmatprep.subr.bf16.mxu0 %v1992_v61  ;;  %1152 = vmatprep.subr.bf16.mxu1 %v1995_v62 }
 0x139   :  { %1071 = vmatpush1.bf16.msra.mxu0 %v1990_v63  ;;  %1153 = vmatpush1.bf16.msra.mxu1 %v1993_v0 }
 0x13a   :  { %1745 = vmatprep.subr.bf16.mxu0 %v1996_v3  ;;  %1767 = vmatprep.subr.bf16.mxu1 %v1997_v4 }
 0x13c   :  { %1073 = vmatmul.mubr.bf16.vlgmr.msra.gmra.mrb[4].mxu0 %v229_v6  ;;  %1155 = vmatmul.mubr.bf16.vlgmr.msra.gmra.mrb[4].mxu1 %v229_v6 }
 0x13d   :  { %1746 = vmatpush3.bf16.msra.mxu0 %v1998_v5  ;;  %1768 = vmatpush3.bf16.msra.mxu1 %v1999_v50 }
 0x13e   :  { %1747 = vmatprep.subr.bf16.mxu0 %v2000_v7  ;;  %1769 = vmatprep.subr.bf16.mxu1 %v2001_v8 }
 0x141   :  { %1748 = vmatpush3.bf16.msra.mxu0 %v2002_v9  ;;  %1770 = vmatpush3.bf16.msra.mxu1 %v2003_v10 }
 0x142   :  { %1749 = vmatprep.subr.bf16.mxu0 %v2004_v11  ;;  %1771 = vmatprep.subr.bf16.mxu1 %v2005_v12  ;;  %v1712_v11 = vld [vmem:[#allocation2] ss:$0 sm:$0xff] }
 0x145   :  { %1750 = vmatpush3.bf16.msra.mxu0 %v2006_v13  ;;  %1772 = vmatpush3.bf16.msra.mxu1 %v2007_v14 }
 0x146   :  { %1751 = vmatprep.subr.bf16.mxu0 %v2008_v15  ;;  %1773 = vmatprep.subr.bf16.mxu1 %v2009_v16 }
 0x149   :  { %1752 = vmatpush3.bf16.msra.mxu0 %v2010_v17  ;;  %1774 = vmatpush3.bf16.msra.mxu1 %v2011_v18 }
 0x14a   :  { %1753 = vmatprep.subr.bf16.mxu0 %v2012_v19  ;;  %1775 = vmatprep.subr.bf16.mxu1 %v2013_v21 }
 0x14d   :  { %1754 = vmatpush3.bf16.msra.mxu0 %v2014_v22  ;;  %1776 = vmatpush3.bf16.msra.mxu1 %v2015_v23 }
 0x14e   :  { %1755 = vmatprep.subr.bf16.mxu0 %v2016_v24  ;;  %1777 = vmatprep.subr.bf16.mxu1 %v2017_v28 }
 0x151   :  { %1756 = vmatpush3.bf16.msra.mxu0 %v2018_v29  ;;  %1778 = vmatpush3.bf16.msra.mxu1 %v2019_v30 }
 0x152   :  { %1757 = vmatprep.subr.bf16.mxu0 %v2020_v31  ;;  %1779 = vmatprep.subr.bf16.mxu1 %v2021_v32 }
 0x155   :  { %1758 = vmatpush3.bf16.msra.mxu0 %v2022_v33  ;;  %1780 = vmatpush3.bf16.msra.mxu1 %v2023_v34 }
 0x156   :  { %1759 = vmatprep.subr.bf16.mxu0 %v2024_v35  ;;  %1781 = vmatprep.subr.bf16.mxu1 %v2025_v36 }
 0x159   :  { %1760 = vmatpush3.bf16.msra.mxu0 %v2026_v37  ;;  %1782 = vmatpush3.bf16.msra.mxu1 %v2027_v38 }
 0x20f   :  { %v1074_v55 = vpop.f32.mrb[4].mxu0  ;;  %v1156_v56 = vpop.f32.mrb[4].mxu1 }
 0x210   :  { %v1163_v57 = vpack.c.bf16 %v1074_v55, %v1074_v55  ;;  %v1165_v27 = vpack.c.bf16 %v1156_v56, %v1156_v56  ;;  %v1076_v58 = vpop.f32.mrb[5].mxu0  ;;  %v1158_v59 = vpop.f32.mrb[5].mxu1 }
 0x211   :  { %v1164_v60 = vpack.c.bf16 %v1076_v58, %v1076_v58  ;;  %v1166_v61 = vpack.c.bf16 %v1158_v59, %v1158_v59  ;;  %v1078_v62 = vpop.f32.mrb[6].mxu0  ;;  %v1160_v63 = vpop.f32.mrb[6].mxu1 }
 0x212   :  { %v1221_v0 = vadd.bf16 %v1199_v53, %v1163_v57  ;;  %v1223_v2 = vadd.bf16 %v1213_v54, %v1165_v27  ;;  %v1079_v3 = vpop.f32.mrb[7].mxu0  ;;  %v1161_v4 = vpop.f32.mrb[7].mxu1 }
 0x213   :  { %v1222_v5 = vadd.bf16 %v1206_v20, %v1164_v60  ;;  %v1224_v50 = vadd.bf16 %v1220_v26, %v1166_v61 }
 0x214   :  { %v1225_v25 = vmax.bf16 %v2057_v1, %v1221_v0  ;;  %v1227_v8 = vmax.bf16 %v2057_v1, %v1223_v2 }
 0x215   :  { %v1226_v6 = vmax.bf16 %v2057_v1, %v1222_v5  ;;  %v1228_v7 = vmax.bf16 %v2057_v1, %v1224_v50 }
 0x217   :  { %1524 = vmatprep.mubr.bf16.mxu0 %v1226_v6  ;;  %1564 = vmatprep.mubr.bf16.mxu1 %v1228_v7 }
 0x218   :  { %1525 = vmatmul.mubr.bf16.vlgmr.msra.gmra.mrb[8].mxu0 %v1225_v25  ;;  %1565 = vmatmul.mubr.bf16.vlgmr.msra.gmra.mrb[8].mxu1 %v1227_v8 }
 0x2eb   :  { %v1761_v9 = vpop.f32.mrb[8].mxu0  ;;  %v1783_v10 = vpop.f32.mrb[8].mxu1 }
 0x2ec   :  { %v1762_v12 = vpop.f32.mrb[9].mxu0  ;;  %v1784_v13 = vpop.f32.mrb[9].mxu1 }
 0x2ed   :  { %v1763_v14 = vadd.f32 %v1762_v12, %v1761_v9  ;;  %v1785_v15 = vadd.f32 %v1784_v13, %v1783_v10  ;;  %v1764_v16 = vpop.f32.mrb[10].mxu0  ;;  %v1786_v17 = vpop.f32.mrb[10].mxu1 }
 0x2ee   :  { %v1765_v18 = vpop.f32.mrb[11].mxu0  ;;  %v1787_v19 = vpop.f32.mrb[11].mxu1 }
 0x2ef   :  { %v1527_v21 = vadd.f32 %v1763_v14, %v1712_v11 }
 0x2f1   :  { %v1567_v22 = vadd.f32 %v1785_v15, %v1527_v21 }
 0x2f3   :  { %2028 = vtanh.f32 %v1567_v22 }
 0x2fd   :  { %v2029_v1 = vpop.eup %2028 }
 0x2fe   :  { %1574 = vst.msk [vmem:[%s2296_s10] sm:$0xff] %vm1573_vm2, %v2029_v1 }
 0x2ff   :  { %1579 = vsyncpa [#allocation4], 1 }

</bundles_post_ra>
